<compile_context>
chip_gen: v7x
topology: tpu7x:2x2x1
jax: 0.10.0
libtpu: 0.0.40
codegen_flags: <defaults>
</compile_context>

<pallas_src>
import jax
import jax.numpy as jnp
import numpy as np
from jax.experimental import pallas as pl
from jax.experimental.pallas import tpu as pltpu


def _make_nf_kernel(num_layers, pack):
    """Fused K-layer planar flow on a lane-packed (TBp, D*pack) batch tile."""

    def kernel(wbd_ref, uhat_ref, psel_ref, b_ref, uw_ref, z_ref, x_ref, ld_ref):
        z = z_ref[...].astype(jnp.float32)          # (TBp, Dp), lane-dense
        det_acc = jnp.ones(z.shape, jnp.float32)    # running |det| product

        # K is a small static constant -> fully unrolled, all indices static.
        for k in range(num_layers):
            # Block-diagonal MXU matmul: each D-lane segment of `hidden` holds
            # (w_k . z_row + b_k) already broadcast across the segment.
            hidden = jnp.dot(z, wbd_ref[k],
                             preferred_element_type=jnp.float32) + b_ref[k]
            h = jnp.tanh(hidden)                                   # (TBp, Dp)
            z = z + uhat_ref[k:k + 1, :] * h                       # (TBp, Dp)
            h_prime = 1.0 - h * h
            det_acc = det_acc * (jnp.abs(1.0 + h_prime * uw_ref[k]) + 1e-15)

        x_ref[...] = z.astype(x_ref.dtype)

        # Exact 0/1 selection matmul compacts the (pack-fold redundant)
        # per-segment products to `pack` lanes; a single log for all layers.
        det_sel = jnp.dot(det_acc, psel_ref[...],
                          preferred_element_type=jnp.float32)      # (TBp, Dp)
        ld_ref[...] = jnp.log(det_sel[:, 0:pack])                  # (TBp, pack)

    return kernel


def _choose_packed_tile(rp, requested_rows, pack):
    """Pick packed-rows tile size.  Returns (tile_packed_rows, padded_rows)."""
    if requested_rows is not None:
        tbp = max(1, int(requested_rows) // pack)
    elif rp <= 128:
        return rp, rp                         # small batch: one resident tile
    else:
        # ~512 packed rows (~2048 original @ pack=4) and >= 8 grid steps.
        tbp = min(512, -(-rp // 8))
    if tbp >= rp:
        return rp, rp
    tbp = max(8, tbp - tbp % 8)               # sublane-aligned multi-tile blocks
    for t in range(tbp, 7, -8):               # prefer a divisor: no HBM pad pass
        if rp % t == 0:
            return t, rp
    return tbp, -(-rp // tbp) * tbp           # fallback: pad the packed rows


def normalizing_flow(z, us, ws, bs, *, tile_rows=None):
    """Fused normalizing-flow forward.

    z:  (B, D);  us, ws: (K, D);  bs: (K,)
    returns (x: (B, D) in z.dtype, log_jacobians: (B,) float32)
    """
    B, D = z.shape
    K = us.shape[0]

    us32 = us.astype(jnp.float32)
    ws32 = ws.astype(jnp.float32)
    bs32 = bs.astype(jnp.float32).reshape(K)

    # ---- hoisted per-layer constants (independent of the batch) ----
    wu = jnp.sum(ws32 * us32, axis=-1)                       # (K,)  w·u
    m_wu = -1.0 + jax.nn.softplus(wu)                        # stable -1+log(1+e^x)
    w_norm_sq = jnp.sum(ws32 * ws32, axis=-1)
    u_hat = us32 + ((m_wu - wu) / (w_norm_sq + 1e-15))[:, None] * ws32   # (K, D)
    uw = jnp.sum(u_hat * ws32, axis=-1)                      # (K,)  u_hat·w

    # ---- lane packing: (B, D) -> (B/pack, D*pack), no cast, no pad ----
    pack = 128 // D if (D <= 128 and 128 % D == 0) else 1
    zin = z
    Bq = B
    if B % pack != 0:                                        # tiny fallback pad
        extra = pack - B % pack
        zin = jnp.concatenate([z, jnp.zeros((extra, D), z.dtype)], axis=0)
        Bq = B + extra
    Dp = D * pack
    Rp = Bq // pack
    z_packed = zin.reshape(Rp, Dp)                           # free reshape

    # Packed per-layer constants.
    uhat_t = jnp.tile(u_hat, (1, pack))                      # (K, Dp)
    w_t = jnp.tile(ws32, (1, pack))                          # (K, Dp)
    seg = jnp.arange(Dp) // D
    seg_mask = (seg[:, None] == seg[None, :]).astype(jnp.float32)   # (Dp, Dp)
    wbd = w_t[:, :, None] * seg_mask[None, :, :]             # (K, Dp, Dp)
    psel = jnp.zeros((Dp, Dp), jnp.float32).at[
        jnp.arange(pack) * D, jnp.arange(pack)].set(1.0)     # exact selector

    # ---- batch tiling over packed rows ----
    TBp, Rp_pad = _choose_packed_tile(Rp, tile_rows, pack)
    if Rp_pad != Rp:                                         # rare fallback
        z_packed = jnp.concatenate(
            [z_packed, jnp.zeros((Rp_pad - Rp, Dp), z_packed.dtype)], axis=0)
    num_tiles = Rp_pad // TBp

    kernel = _make_nf_kernel(K, pack)
    x_packed, ld_packed = pl.pallas_call(
        kernel,
        out_shape=(
            jax.ShapeDtypeStruct((Rp_pad, Dp), z.dtype),
            jax.ShapeDtypeStruct((Rp_pad, pack), jnp.float32),
        ),
        grid=(num_tiles,),
        in_specs=[
            pl.BlockSpec((K, Dp, Dp), lambda i: (0, 0, 0)),      # Wbd (resident)
            pl.BlockSpec((K, Dp), lambda i: (0, 0)),             # u_hat tiled
            pl.BlockSpec((Dp, Dp), lambda i: (0, 0)),            # selector
            pl.BlockSpec(memory_space=pltpu.MemorySpace.SMEM),   # b      (K,)
            pl.BlockSpec(memory_space=pltpu.MemorySpace.SMEM),   # u_hat·w(K,)
            pl.BlockSpec((TBp, Dp), lambda i: (i, 0)),           # z tile
        ],
        out_specs=(
            pl.BlockSpec((TBp, Dp), lambda i: (i, 0)),           # x tile
            pl.BlockSpec((TBp, pack), lambda i: (i, 0)),         # log_det tile
        ),
        compiler_params=pltpu.CompilerParams(
            dimension_semantics=("parallel",),                   # split over TCs
        ),
    )(wbd, uhat_t, psel, bs32, uw, z_packed)

    total = Rp_pad * pack
    x = x_packed.reshape(total, D)
    log_det = ld_packed.reshape(total)
    if total != B:
        x = x[:B]
        log_det = log_det[:B]
    return x, log_det


def normalizing_flow_ref(z, us, ws, bs):
    """Pure-JAX reference mirroring the PyTorch NormalizingFlow forward."""
    z = z.astype(jnp.float32)
    logj = jnp.zeros((z.shape[0],), jnp.float32)
    for k in range(us.shape[0]):
        u, w, b = us[k], ws[k], bs[k]
        wu = jnp.dot(w, u)
        u_hat = u + ((-1.0 + jax.nn.softplus(wu)) - wu) * (
            w / (jnp.sum(w * w) + 1e-15))
        hidden = z @ w + b
        h = jnp.tanh(hidden)
        z = z + u_hat[None, :] * h[:, None]
        h_prime = 1.0 - h * h
        logj = logj + jnp.log(jnp.abs(1.0 + h_prime * jnp.dot(u_hat, w)) + 1e-15)
    return z, logj


if __name__ == "__main__":
    K = 4     # flow_length
    D = 32    # data_dim
    B = 64    # batch

    key = jax.random.PRNGKey(0)
    kz, ku, kw, kb = jax.random.split(key, 4)
    # torch.rand -> uniform [0, 1) parameters for each layer
    us = jax.random.uniform(ku, (K, D), dtype=jnp.float32)
    ws = jax.random.uniform(kw, (K, D), dtype=jnp.float32)
    bs = jax.random.uniform(kb, (K,), dtype=jnp.float32)
    z = jax.random.normal(kz, (B, D), dtype=jnp.float32)

    # tile_rows=32 -> 2 grid steps at B=64 to exercise the batch pipeline;
    # production default picks ~2048-row tiles automatically.
    x, log_jac = normalizing_flow(z, us, ws, bs, tile_rows=32)
    jax.block_until_ready((x, log_jac))

    x_ref, log_jac_ref = normalizing_flow_ref(z, us, ws, bs)
    assert x.shape == (B, D) and log_jac.shape == (B,)
    np.testing.assert_allclose(np.asarray(x), np.asarray(x_ref),
                               rtol=2e-5, atol=2e-5)
    np.testing.assert_allclose(np.asarray(log_jac), np.asarray(log_jac_ref),
                               rtol=2e-5, atol=2e-5)
    print("KERNEL_OK")
</pallas_src>

<mosaic_0001>
module attributes {stable_mosaic.version = 11 : i64} {
  func.func @kernel(%arg0: i32, %arg1: memref<4x128x128xf32, #tpu.memory_space<vmem>>, %arg2: memref<4x128xf32, #tpu.memory_space<vmem>>, %arg3: memref<128x128xf32, #tpu.memory_space<vmem>>, %arg4: memref<4xf32, #tpu.memory_space<smem>>, %arg5: memref<4xf32, #tpu.memory_space<smem>>, %arg6: memref<8x128xf32, #tpu.memory_space<vmem>>, %arg7: memref<8x128xf32, #tpu.memory_space<vmem>>, %arg8: memref<8x4xf32, #tpu.memory_space<vmem>>) attributes {dimension_semantics = [#tpu.dimension_semantics<parallel>], iteration_bounds = array<i64: 2>, scalar_prefetch = 0 : i64, scratch_operands = 0 : i64, tpu.core_type = #tpu.core_type<tc>, window_params = [{pipeline_mode = #tpu.pipeline_mode<synchronous>, transform_indices = @transform_0, window_bounds = array<i64: 4, 128, 128>}, {pipeline_mode = #tpu.pipeline_mode<synchronous>, transform_indices = @transform_1, window_bounds = array<i64: 4, 128>}, {pipeline_mode = #tpu.pipeline_mode<synchronous>, transform_indices = @transform_2, window_bounds = array<i64: 128, 128>}, {transform_indices = @transform_3, window_bounds = array<i64: 4>}, {transform_indices = @transform_4, window_bounds = array<i64: 4>}, {transform_indices = @transform_5, window_bounds = array<i64: 8, 128>}, {transform_indices = @transform_6, window_bounds = array<i64: 8, 128>}, {transform_indices = @transform_7, window_bounds = array<i64: 8, 4>}]} {
    %c0 = arith.constant 0 : index
    %c0_0 = arith.constant 0 : index
    %0 = vector.load %arg6[%c0, %c0_0] : memref<8x128xf32, #tpu.memory_space<vmem>>, vector<8x128xf32>
    %cst = arith.constant 1.000000e+00 : f32
    %1 = vector.broadcast %cst : f32 to vector<8x128xf32>
    %c0_1 = arith.constant 0 : index
    %c0_2 = arith.constant 0 : index
    %c0_3 = arith.constant 0 : index
    %2 = vector.load %arg1[%c0_1, %c0_2, %c0_3] : memref<4x128x128xf32, #tpu.memory_space<vmem>>, vector<1x128x128xf32>
    %3 = vector.shape_cast %2 : vector<1x128x128xf32> to vector<128x128xf32>
    %cst_4 = arith.constant dense<0.000000e+00> : vector<8x128xf32>
    %4 = tpu.matmul %0, %3, %cst_4 {dimension_numbers = #tpu.dot_dimension_numbers<[1], [0], [0], [1], [0, 0, 1, 1], [], []>} : vector<8x128xf32>, vector<128x128xf32>, vector<8x128xf32> -> vector<8x128xf32>
    %c0_5 = arith.constant 0 : index
    %5 = memref.load %arg4[%c0_5] : memref<4xf32, #tpu.memory_space<smem>>
    %6 = vector.broadcast %5 : f32 to vector<8x128xf32>
    %7 = arith.addf %4, %6 : vector<8x128xf32>
    %8 = math.tanh %7 : vector<8x128xf32>
    %c0_6 = arith.constant 0 : index
    %c0_7 = arith.constant 0 : index
    %9 = vector.load %arg2[%c0_6, %c0_7] : memref<4x128xf32, #tpu.memory_space<vmem>>, vector<1x128xf32>
    %10 = vector.broadcast %9 : vector<1x128xf32> to vector<8x128xf32>
    %11 = arith.mulf %10, %8 : vector<8x128xf32>
    %12 = arith.addf %0, %11 : vector<8x128xf32>
    %13 = arith.mulf %8, %8 : vector<8x128xf32>
    %cst_8 = arith.constant 1.000000e+00 : f32
    %14 = vector.broadcast %cst_8 : f32 to vector<8x128xf32>
    %15 = arith.subf %14, %13 : vector<8x128xf32>
    %c0_9 = arith.constant 0 : index
    %16 = memref.load %arg5[%c0_9] : memref<4xf32, #tpu.memory_space<smem>>
    %17 = vector.broadcast %16 : f32 to vector<8x128xf32>
    %18 = arith.mulf %15, %17 : vector<8x128xf32>
    %cst_10 = arith.constant 1.000000e+00 : f32
    %19 = vector.broadcast %cst_10 : f32 to vector<8x128xf32>
    %20 = arith.addf %19, %18 : vector<8x128xf32>
    %21 = math.absf %20 : vector<8x128xf32>
    %cst_11 = arith.constant 1.000000e-15 : f32
    %22 = vector.broadcast %cst_11 : f32 to vector<8x128xf32>
    %23 = arith.addf %21, %22 : vector<8x128xf32>
    %24 = arith.mulf %1, %23 : vector<8x128xf32>
    %c1 = arith.constant 1 : index
    %c0_12 = arith.constant 0 : index
    %c0_13 = arith.constant 0 : index
    %25 = vector.load %arg1[%c1, %c0_12, %c0_13] : memref<4x128x128xf32, #tpu.memory_space<vmem>>, vector<1x128x128xf32>
    %26 = vector.shape_cast %25 : vector<1x128x128xf32> to vector<128x128xf32>
    %cst_14 = arith.constant dense<0.000000e+00> : vector<8x128xf32>
    %27 = tpu.matmul %12, %26, %cst_14 {dimension_numbers = #tpu.dot_dimension_numbers<[1], [0], [0], [1], [0, 0, 1, 1], [], []>} : vector<8x128xf32>, vector<128x128xf32>, vector<8x128xf32> -> vector<8x128xf32>
    %c1_15 = arith.constant 1 : index
    %28 = memref.load %arg4[%c1_15] : memref<4xf32, #tpu.memory_space<smem>>
    %29 = vector.broadcast %28 : f32 to vector<8x128xf32>
    %30 = arith.addf %27, %29 : vector<8x128xf32>
    %31 = math.tanh %30 : vector<8x128xf32>
    %c1_16 = arith.constant 1 : index
    %c0_17 = arith.constant 0 : index
    %32 = vector.load %arg2[%c1_16, %c0_17] : memref<4x128xf32, #tpu.memory_space<vmem>>, vector<1x128xf32>
    %33 = vector.broadcast %32 : vector<1x128xf32> to vector<8x128xf32>
    %34 = arith.mulf %33, %31 : vector<8x128xf32>
    %35 = arith.addf %12, %34 : vector<8x128xf32>
    %36 = arith.mulf %31, %31 : vector<8x128xf32>
    %cst_18 = arith.constant 1.000000e+00 : f32
    %37 = vector.broadcast %cst_18 : f32 to vector<8x128xf32>
    %38 = arith.subf %37, %36 : vector<8x128xf32>
    %c1_19 = arith.constant 1 : index
    %39 = memref.load %arg5[%c1_19] : memref<4xf32, #tpu.memory_space<smem>>
    %40 = vector.broadcast %39 : f32 to vector<8x128xf32>
    %41 = arith.mulf %38, %40 : vector<8x128xf32>
    %cst_20 = arith.constant 1.000000e+00 : f32
    %42 = vector.broadcast %cst_20 : f32 to vector<8x128xf32>
    %43 = arith.addf %42, %41 : vector<8x128xf32>
    %44 = math.absf %43 : vector<8x128xf32>
    %cst_21 = arith.constant 1.000000e-15 : f32
    %45 = vector.broadcast %cst_21 : f32 to vector<8x128xf32>
    %46 = arith.addf %44, %45 : vector<8x128xf32>
    %47 = arith.mulf %24, %46 : vector<8x128xf32>
    %c2 = arith.constant 2 : index
    %c0_22 = arith.constant 0 : index
    %c0_23 = arith.constant 0 : index
    %48 = vector.load %arg1[%c2, %c0_22, %c0_23] : memref<4x128x128xf32, #tpu.memory_space<vmem>>, vector<1x128x128xf32>
    %49 = vector.shape_cast %48 : vector<1x128x128xf32> to vector<128x128xf32>
    %cst_24 = arith.constant dense<0.000000e+00> : vector<8x128xf32>
    %50 = tpu.matmul %35, %49, %cst_24 {dimension_numbers = #tpu.dot_dimension_numbers<[1], [0], [0], [1], [0, 0, 1, 1], [], []>} : vector<8x128xf32>, vector<128x128xf32>, vector<8x128xf32> -> vector<8x128xf32>
    %c2_25 = arith.constant 2 : index
    %51 = memref.load %arg4[%c2_25] : memref<4xf32, #tpu.memory_space<smem>>
    %52 = vector.broadcast %51 : f32 to vector<8x128xf32>
    %53 = arith.addf %50, %52 : vector<8x128xf32>
    %54 = math.tanh %53 : vector<8x128xf32>
    %c2_26 = arith.constant 2 : index
    %c0_27 = arith.constant 0 : index
    %55 = vector.load %arg2[%c2_26, %c0_27] : memref<4x128xf32, #tpu.memory_space<vmem>>, vector<1x128xf32>
    %56 = vector.broadcast %55 : vector<1x128xf32> to vector<8x128xf32>
    %57 = arith.mulf %56, %54 : vector<8x128xf32>
    %58 = arith.addf %35, %57 : vector<8x128xf32>
    %59 = arith.mulf %54, %54 : vector<8x128xf32>
    %cst_28 = arith.constant 1.000000e+00 : f32
    %60 = vector.broadcast %cst_28 : f32 to vector<8x128xf32>
    %61 = arith.subf %60, %59 : vector<8x128xf32>
    %c2_29 = arith.constant 2 : index
    %62 = memref.load %arg5[%c2_29] : memref<4xf32, #tpu.memory_space<smem>>
    %63 = vector.broadcast %62 : f32 to vector<8x128xf32>
    %64 = arith.mulf %61, %63 : vector<8x128xf32>
    %cst_30 = arith.constant 1.000000e+00 : f32
    %65 = vector.broadcast %cst_30 : f32 to vector<8x128xf32>
    %66 = arith.addf %65, %64 : vector<8x128xf32>
    %67 = math.absf %66 : vector<8x128xf32>
    %cst_31 = arith.constant 1.000000e-15 : f32
    %68 = vector.broadcast %cst_31 : f32 to vector<8x128xf32>
    %69 = arith.addf %67, %68 : vector<8x128xf32>
    %70 = arith.mulf %47, %69 : vector<8x128xf32>
    %c3 = arith.constant 3 : index
    %c0_32 = arith.constant 0 : index
    %c0_33 = arith.constant 0 : index
    %71 = vector.load %arg1[%c3, %c0_32, %c0_33] : memref<4x128x128xf32, #tpu.memory_space<vmem>>, vector<1x128x128xf32>
    %72 = vector.shape_cast %71 : vector<1x128x128xf32> to vector<128x128xf32>
    %cst_34 = arith.constant dense<0.000000e+00> : vector<8x128xf32>
    %73 = tpu.matmul %58, %72, %cst_34 {dimension_numbers = #tpu.dot_dimension_numbers<[1], [0], [0], [1], [0, 0, 1, 1], [], []>} : vector<8x128xf32>, vector<128x128xf32>, vector<8x128xf32> -> vector<8x128xf32>
    %c3_35 = arith.constant 3 : index
    %74 = memref.load %arg4[%c3_35] : memref<4xf32, #tpu.memory_space<smem>>
    %75 = vector.broadcast %74 : f32 to vector<8x128xf32>
    %76 = arith.addf %73, %75 : vector<8x128xf32>
    %77 = math.tanh %76 : vector<8x128xf32>
    %c3_36 = arith.constant 3 : index
    %c0_37 = arith.constant 0 : index
    %78 = vector.load %arg2[%c3_36, %c0_37] : memref<4x128xf32, #tpu.memory_space<vmem>>, vector<1x128xf32>
    %79 = vector.broadcast %78 : vector<1x128xf32> to vector<8x128xf32>
    %80 = arith.mulf %79, %77 : vector<8x128xf32>
    %81 = arith.addf %58, %80 : vector<8x128xf32>
    %82 = arith.mulf %77, %77 : vector<8x128xf32>
    %cst_38 = arith.constant 1.000000e+00 : f32
    %83 = vector.broadcast %cst_38 : f32 to vector<8x128xf32>
    %84 = arith.subf %83, %82 : vector<8x128xf32>
    %c3_39 = arith.constant 3 : index
    %85 = memref.load %arg5[%c3_39] : memref<4xf32, #tpu.memory_space<smem>>
    %86 = vector.broadcast %85 : f32 to vector<8x128xf32>
    %87 = arith.mulf %84, %86 : vector<8x128xf32>
    %cst_40 = arith.constant 1.000000e+00 : f32
    %88 = vector.broadcast %cst_40 : f32 to vector<8x128xf32>
    %89 = arith.addf %88, %87 : vector<8x128xf32>
    %90 = math.absf %89 : vector<8x128xf32>
    %cst_41 = arith.constant 1.000000e-15 : f32
    %91 = vector.broadcast %cst_41 : f32 to vector<8x128xf32>
    %92 = arith.addf %90, %91 : vector<8x128xf32>
    %93 = arith.mulf %70, %92 : vector<8x128xf32>
    %c0_42 = arith.constant 0 : index
    %c0_43 = arith.constant 0 : index
    %94 = vector.load %arg7[%c0_42, %c0_43] : memref<8x128xf32, #tpu.memory_space<vmem>>, vector<8x128xf32>
    tpu.vector_store %arg7[%c0_42, %c0_43], %81 {strides = array<i32>} : memref<8x128xf32, #tpu.memory_space<vmem>>, vector<8x128xf32>,
    %c0_44 = arith.constant 0 : index
    %c0_45 = arith.constant 0 : index
    %95 = vector.load %arg3[%c0_44, %c0_45] : memref<128x128xf32, #tpu.memory_space<vmem>>, vector<128x128xf32>
    %cst_46 = arith.constant dense<0.000000e+00> : vector<8x128xf32>
    %96 = tpu.matmul %93, %95, %cst_46 {dimension_numbers = #tpu.dot_dimension_numbers<[1], [0], [0], [1], [0, 0, 1, 1], [], []>} : vector<8x128xf32>, vector<128x128xf32>, vector<8x128xf32> -> vector<8x128xf32>
    %97 = vector.extract_strided_slice %96 {offsets = [0, 0], sizes = [8, 4], strides = [1, 1]} : vector<8x128xf32> to vector<8x4xf32>
    %98 = math.log %97 : vector<8x4xf32>
    %c0_47 = arith.constant 0 : index
    %c0_48 = arith.constant 0 : index
    %99 = vector.load %arg8[%c0_47, %c0_48] : memref<8x4xf32, #tpu.memory_space<vmem>>, vector<8x4xf32>
    tpu.vector_store %arg8[%c0_47, %c0_48], %98 {strides = array<i32>} : memref<8x4xf32, #tpu.memory_space<vmem>>, vector<8x4xf32>,
    return
  }
  func.func @transform_0(%arg0: i32) -> (i32, i32, i32) {
    %c0_i32 = arith.constant 0 : i32
    %c0_i32_0 = arith.constant 0 : i32
    %c0_i32_1 = arith.constant 0 : i32
    %c0_i32_2 = arith.constant 0 : i32
    return %c0_i32, %c0_i32_0, %c0_i32_1 : i32, i32, i32
  }
  func.func @transform_1(%arg0: i32) -> (i32, i32) {
    %c0_i32 = arith.constant 0 : i32
    %c0_i32_0 = arith.constant 0 : i32
    %c0_i32_1 = arith.constant 0 : i32
    return %c0_i32, %c0_i32_0 : i32, i32
  }
  func.func @transform_2(%arg0: i32) -> (i32, i32) {
    %c0_i32 = arith.constant 0 : i32
    %c0_i32_0 = arith.constant 0 : i32
    %c0_i32_1 = arith.constant 0 : i32
    return %c0_i32, %c0_i32_0 : i32, i32
  }
  func.func @transform_3(%arg0: i32) -> i32 {
    %c0_i32 = arith.constant 0 : i32
    %c0_i32_0 = arith.constant 0 : i32
    return %c0_i32 : i32
  }
  func.func @transform_4(%arg0: i32) -> i32 {
    %c0_i32 = arith.constant 0 : i32
    %c0_i32_0 = arith.constant 0 : i32
    return %c0_i32 : i32
  }
  func.func @transform_5(%arg0: i32) -> (i32, i32) {
    %c0_i32 = arith.constant 0 : i32
    %c0_i32_0 = arith.constant 0 : i32
    return %arg0, %c0_i32 : i32, i32
  }
  func.func @transform_6(%arg0: i32) -> (i32, i32) {
    %c0_i32 = arith.constant 0 : i32
    %c0_i32_0 = arith.constant 0 : i32
    return %arg0, %c0_i32 : i32, i32
  }
  func.func @transform_7(%arg0: i32) -> (i32, i32) {
    %c0_i32 = arith.constant 0 : i32
    %c0_i32_0 = arith.constant 0 : i32
    return %arg0, %c0_i32 : i32, i32
  }
}

</mosaic_0001>

<bundles_post_ra>
// kernel: tpu_custom_call.1
= control target key start
LH: loop header
LB: loop body
LE: loop exit
PB: predicated region body
PF: predicated region fallthrough
CT: control target
= control target key end

     0   :  { %s2055_s0 = inlined_call_operand.hbm [shape: f32[4,128,128], index: 0, kind: input, shape index: {}]   ;;  %s2056_s1 = inlined_call_operand.hbm [shape: f32[4,128], index: 1, kind: input, shape index: {}]   ;;  %s2057_s2 = inlined_call_operand.hbm [shape: f32[128,128], index: 2, kind: input, shape index: {}]   ;;  %s2058_s3 = inlined_call_operand.vmem [shape: f32[4], index: 3, kind: input, shape index: {}]   ;;  %s2059_s4 = inlined_call_operand.vmem [shape: f32[4], index: 4, kind: input, shape index: {}]   ;;  %s2060_s5 = inlined_call_operand.vmem [shape: f32[16,128], index: 5, kind: input, shape index: {}]   ;;  %s2061_s6 = inlined_call_operand.hbm [shape: f32[16,128], index: 6, kind: output, shape index: {0}]   ;;  %s2062_s7 = inlined_call_operand.vmem [shape: f32[16,4], index: 7, kind: output, shape index: {1}]  }
   0x1   :  { %2070 = sst [smem:[#allocation22_spill]] %s2056_s1 }
   0x2   :  { %13 = vsyncpa [#allocation3], 0 }
   0x3   :  { %14 = vsyncpa [#allocation7], 0 }
   0x4   :  { %15 = vsyncpa [#allocation5], 0 }
   0x5   :  { %16 = vsyncpa [#allocation11], 0 }
   0x6   :  { %17 = vsyncpa [#allocation4], 0 }
   0x7   :  { %19 = vsyncpa [#allocation4 + $0x1], 0  ;;  %s1786_s24 = smov 0   ;;  %s1788_s25 = smov 0  }
   0x8   :  { %s1790_s26 = smov 0   ;;  %s1792_s27 = smov 0  }
   0x9 LB: > { %2071 = sst [smem:[#allocation18_spill]] %s1729_s26  ;;  %s1807_s28 = sadd.s32 4294967295, %s1733_s27   ;;  %s1733_s27 = sphi %s1792_s27, %s2093_s27   ;;  %s1729_s26 = sphi %s1790_s26, %s2095_s26   ;;  %s1725_s25 = sphi %s1788_s25, %s2097_s25   ;;  %s1721_s24 = sphi %s1786_s24, %s2096_s24  }
   0xa   : > { %s1025_s29 = sadd.s32 4294967294, %s1733_s27   ;;  %s1811_s30 = sadd.s32 1, %s1733_s27  }
   0xb   : > { %2072 = sst [smem:[#allocation19_spill]] %s1811_s30  ;;  %s163_s8 = sadd.s32 1, %s1729_s26 }
   0xc   : > { %s160_s9 = ssub.s32 %s1733_s27, %s1811_s30  ;;  %p173_p0 = scmp.ne.s32.totalorder %s1729_s26, %s1725_s25 }
   0xd   : > { %p161_p1 = scmp.eq.s32.totalorder %s160_s9, 0  ;;  %p174_p2 = scmp.eq.s32.totalorder %s1807_s28, 1 }
   0xe   : > { %p179_p3 = scmp.ne.s32.totalorder %s1725_s25, %s1721_s24  ;;  %p180_p4 = scmp.eq.s32.totalorder %s1025_s29, 1 }
   0xf   : > { %s1822_s10 = scalar_select %p161_p1, %s1729_s26, %s163_s8  }
  0x10   : > { %p1824_p5 = por %p174_p2, %p173_p0  ;;  %p1828_p6 = por %p180_p4, %p179_p3 }
  0x11   : > { %2073 = sst [smem:[#allocation20_spill]] %s1822_s10  ;;  %p1026_p7 = scmp.ge.s32.totalorder %s1733_s27, 1 }
  0x12   : > { %s2074_s11 = scalar_select %p1824_p5, 1, 0 }
  0x13   : > { %s2075_s12 = scalar_select %p1828_p6, 1, 0 }
  0x14   : > { %p213_p8 = scmp.lt.s32.totalorder %s1733_s27, 3  ;;  %p2063_p9 = scmp.eq.s32.totalorder %s1807_s28, 0 }
  0x15   : > { %2076 = sst [smem:[#allocation21_spill]] %s2075_s12  ;;  %s1735_s14 = smov [#allocation6]  }
  0x16   : > { %p1835_p10 = pnand %p1026_p7, %p213_p8  ;;  %s239_s15 = sshll.u32 %s1735_s14, 4  ;;  %s240_s15 = int_to_ptr.vmem [resolvable:$true] %s239_s15 }
  0x17   : > { %s1736_s16 = smov [#allocation2]   ;;  %s1737_s19 = smov [#allocation8]  }
  0x18   : > { %s2077_s13 = scalar_select %p1835_p10, 1, 0 }
  0x19   : > { %p1458_p11 = pneg %p1835_p10  ;;  %s225_s17 = sshll.u32 %s1736_s16, 4  ;;  %s1847_s17 = int_to_ptr.vmem [resolvable:$true] %s225_s17 }
  0x1a   : > { %s1849_s20 = sshll.u32 %s1737_s19, 4  ;;  %s2079_s1 = sld [smem:[#allocation22_spill]]  ;;  %s250_s20 = int_to_ptr.vmem [resolvable:$true] %s1849_s20 }
  0x1b   : > { %p1843_p12 = pnand %p2063_p9, %p1458_p11 }
  0x1d   : > { %p1859_p0 = pneg %p1843_p12 }
  0x20   : > { %s1541_s23 = scalar_lea.hbm %s2079_s1, 64 }
  0x21   : > { %p1542_p13 = scmp.ne.s32.totalorder %s2079_s1, %s1541_s23  ;;  %p1548_p3 = scmp.lt.u32.totalorder %s1541_s23, %s2079_s1 }
  0x23   : > { %p1544_p1 = pnand %p1859_p0, %p1542_p13 }
  0x25   : > { %p1545_p2 = pneg %p1544_p1 }
  0x27   : > { %p1550_p4 = pnand %p1548_p3, %p1545_p2 }
  0x29   : > { %1553 = shalt.err (!%p1550_p4)
}
  0x2a   : > { %s1554_s19 = scalar_lea.vmem %s240_s15, 64  ;;  %p1562_p9 = scmp.lt.s32.totalorder %s240_s15, %s240_s15 }
  0x2b   : > { %p1555_p7 = scmp.ne.s32.totalorder %s240_s15, %s1554_s19  ;;  %p1563_p6 = scmp.lt.s32.totalorder %s1554_s19, %s1554_s19 }
  0x2d   : > { %p1557_p8 = pnand %p1555_p7, %p1859_p0  ;;  %p1564_p5 = por %p1563_p6, %p1562_p9 }
  0x2f   : > { %p1558_p11 = pneg %p1557_p8 }
  0x31   : > { %p1565_p10 = pnand %p1564_p5, %p1558_p11 }
  0x33   : > { %1568 = shalt.err (!%p1565_p10)
}
  0x34   : > { %1464 = dma.hbm_to_vmem [thread:$0]  (!%p1843_p12), %s2079_s1, 64, %s240_s15, [#allocation7]  }
  0x35   : > { %s1569_s8 = scalar_lea.hbm %s2055_s0, 8192 }
  0x36   : > { %p1570_p13 = scmp.ne.s32.totalorder %s2055_s0, %s1569_s8  ;;  %p1576_p5 = scmp.lt.u32.totalorder %s1569_s8, %s2055_s0 }
  0x38   : > { %p1572_p1 = pnand %p1570_p13, %p1859_p0 }
  0x3a   : > { %p1573_p6 = pneg %p1572_p1 }
  0x3c   : > { %p1578_p9 = pnand %p1576_p5, %p1573_p6 }
  0x3e   : > { %1581 = shalt.err (!%p1578_p9)
}
  0x3f   : > { %s1582_s15 = scalar_lea.vmem %s1847_s17, 8192  ;;  %p1590_p4 = scmp.lt.s32.totalorder %s1847_s17, %s1847_s17 }
  0x40   : > { %p1583_p10 = scmp.ne.s32.totalorder %s1847_s17, %s1582_s15  ;;  %p1591_p7 = scmp.lt.s32.totalorder %s1582_s15, %s1582_s15 }
  0x42   : > { %p1585_p2 = pnand %p1583_p10, %p1859_p0  ;;  %p1592_p8 = por %p1591_p7, %p1590_p4 }
  0x44   : > { %p1586_p3 = pneg %p1585_p2 }
  0x46   : > { %p1593_p11 = pnand %p1592_p8, %p1586_p3 }
  0x48   : > { %1596 = shalt.err (!%p1593_p11)
}
  0x49   : > { %s1738_s21 = smov 128   ;;  %s1739_s10 = smov 8  }
  0x4a   : > { %1461 = dma.hbm_to_vmem [thread:$0]  (!%p1843_p12), %s2055_s0, 8192, %s1847_s17, [#allocation3], %s1738_s21, %s1738_s21, %s1739_s10  }
  0x4b   : > { %s263_s14 = sshll.u32 %s2058_s3, 4  ;;  %s1597_s15 = scalar_lea.hbm %s2057_s2, 2048  ;;  %s264_s14 = int_to_ptr.vmem [resolvable:$true] %s263_s14 }
  0x4c   : > { %p1598_p13 = scmp.ne.s32.totalorder %s2057_s2, %s1597_s15  ;;  %p1604_p5 = scmp.lt.u32.totalorder %s1597_s15, %s2057_s2 }
  0x4e   : > { %p1600_p1 = pnand %p1598_p13, %p1859_p0 }
  0x50   : > { %p1601_p6 = pneg %p1600_p1 }
  0x52   : > { %p1606_p9 = pnand %p1604_p5, %p1601_p6 }
  0x54   : > { %1609 = shalt.err (!%p1606_p9)
}
  0x55   : > { %s1610_s17 = scalar_lea.vmem %s250_s20, 2048  ;;  %p1618_p4 = scmp.lt.s32.totalorder %s250_s20, %s250_s20 }
  0x56   : > { %p1611_p10 = scmp.ne.s32.totalorder %s250_s20, %s1610_s17  ;;  %p1619_p7 = scmp.lt.s32.totalorder %s1610_s17, %s1610_s17 }
  0x58   : > { %p1613_p2 = pnand %p1611_p10, %p1859_p0  ;;  %p1620_p8 = por %p1619_p7, %p1618_p4 }
  0x5a   : > { %p1614_p3 = pneg %p1613_p2 }
  0x5c   : > { %p1621_p11 = pnand %p1620_p8, %p1614_p3 }
  0x5e   : > { %1624 = shalt.err (!%p1621_p11)
}
  0x5f   : > { %1467 = dma.hbm_to_vmem [thread:$0]  (!%p1843_p12), %s2057_s2, 2048, %s250_s20, [#allocation7], %s1738_s21, %s1738_s21, %s1739_s10  }
  0x60   : > { %s1625_s30 = scalar_lea.vmem %s264_s14, 16  ;;  %p1633_p5 = scmp.lt.s32.totalorder %s264_s14, %s264_s14 }
  0x61   : > { %p1626_p13 = scmp.ne.s32.totalorder %s264_s14, %s1625_s30  ;;  %p1634_p9 = scmp.lt.s32.totalorder %s1625_s30, %s1625_s30 }
  0x63   : > { %p1628_p1 = pnand %p1626_p13, %p1859_p0  ;;  %p1635_p10 = por %p1634_p9, %p1633_p5 }
  0x65   : > { %p1629_p6 = pneg %p1628_p1 }
  0x67   : > { %p1636_p2 = pnand %p1635_p10, %p1629_p6 }
  0x69   : > { %1639 = shalt.err (!%p1636_p2)
}
  0x6a   : > { %s1740_s12 = smov [#allocation9]   ;;  %s274_s20 = sshll.u32 %s2059_s4, 4  ;;  %s275_s20 = int_to_ptr.vmem [resolvable:$true] %s274_s20 }
  0x6b   : > { %1470 = dma.vmem_to_smem (!%p1843_p12), %s264_s14, 16, %s1740_s12, [#allocation5]  }
  0x6c   : > { %s1640_s21 = scalar_lea.vmem %s275_s20, 16  ;;  %p1648_p8 = scmp.lt.s32.totalorder %s275_s20, %s275_s20 }
  0x6d   : > { %p1641_p3 = scmp.ne.s32.totalorder %s275_s20, %s1640_s21  ;;  %p1649_p11 = scmp.lt.s32.totalorder %s1640_s21, %s1640_s21 }
  0x6f   : > { %p1643_p4 = pnand %p1641_p3, %p1859_p0  ;;  %p1650_p13 = por %p1649_p11, %p1648_p8 }
  0x71   : > { %p1644_p7 = pneg %p1643_p4 }
  0x73   : > { %p1651_p1 = pnand %p1650_p13, %p1644_p7 }
  0x75   : > { %1654 = shalt.err (!%p1651_p1)
}
  0x76   : > { %s1741_s10 = smov [#allocation10]   ;;  %p2081_p6 = scmp.ne.s32.totalorder %s2077_s13, 0 }
  0x77   : > { %1473 = dma.vmem_to_smem (!%p1843_p12), %s275_s20, 16, %s1741_s10, [#allocation11]  }
  0x78   : > { %294 = sbr.rel (%p2081_p6) target bundleno = 1326 (0x52e), region = 44  ;;  %p2082_p5 = scmp.eq.s32.totalorder (!%p2081_p6), %s1807_s28, 0 }
  0x7f   : > { %1700 = dma.done.wait (%p2082_p5), [#allocation3], 8192   ;;  %p2083_p9 = pmov %p2082_p5 }
  0x80   : > { %p2084_p0 = pmov %p2082_p5 }
  0x81   : > { %1702 = vsyncadd (%p2083_p9), [#allocation3], 4294959104 }
  0x82   : > { %1704 = dma.done.wait (%p2084_p0), [#allocation7], 2112   ;;  %p2085_p10 = pmov %p2084_p0 }
  0x83   : > { %p2086_p2 = pmov %p2084_p0 }
  0x84   : > { %1706 = vsyncadd (%p2085_p10), [#allocation7], 4294965184 }
  0x85   : > { %1708 = dma.done.wait (%p2086_p2), [#allocation5], 16   ;;  %p2087_p12 = pmov %p2084_p0 }
  0x86   : > { %p2088_p3 = pmov %p2084_p0 }
  0x87   : > { %1710 = vsyncadd (%p2087_p12), [#allocation5], 4294967280 }
  0x88   : > { %1712 = dma.done.wait (%p2088_p3), [#allocation11], 16   ;;  %p2089_p4 = pmov %p2084_p0 }
  0x8a   : > { %1714 = vsyncadd (%p2089_p4), [#allocation11], 4294967280 }
  0x8b   : > { %316 = sfence }
  0x8c   : > { %v355_v0 = vld [vmem:[#allocation2] sm:$0xff]  ;;  %v356_v1 = vld [vmem:[#allocation2 + $0x8] sm:$0xff]  ;;  %v357_v2 = vld [vmem:[#allocation2 + $0x10] sm:$0xff]  ;;  %v1742_v3 = vmov 0.0|0.0   ;;  %vm1743_vm0 = vmmov 0   ;;  %v1744_v6 = vmov 0.0  }
  0x8d   : > { %1316 = vmatprep.subr.bf16.mxu0 %v1742_v3  ;;  %v1317_v4 = vpack.c.bf16 %v356_v1, %v355_v0  ;;  %v358_v5 = vld [vmem:[#allocation2 + $0x18] sm:$0xff]  ;;  %1173 = vmatprep.mubr.msk.f32.mxu0 %vm1743_vm0, %v1744_v6  ;;  %v359_v8 = vld [vmem:[#allocation2 + $0x20] sm:$0xff]  ;;  %v360_v9 = vld [vmem:[#allocation2 + $0x28] sm:$0xff]  ;;  %p346_p7 = scmp.lt.s32.totalorder %s1807_s28, 1  ;;  %s371_s14 = sld [smem:[#allocation9]] }
  0x8e   : > { %1340 = vmatprep.subr.bf16.mxu1 %v1742_v3  ;;  %1208 = vmatprep.mubr.msk.f32.mxu1 %vm1743_vm0, %v1744_v6  ;;  %v1320_v7 = vpack.c.bf16 %v358_v5, %v357_v2  ;;  %v460_v10 = vld [vmem:[#allocation2 + $0x80] sm:$0xff]  ;;  %v461_v11 = vld [vmem:[#allocation2 + $0x88] sm:$0xff]  ;;  %v462_v13 = vld [vmem:[#allocation2 + $0x90] sm:$0xff]  ;;  %v1323_v15 = vpack.c.bf16 %v360_v9, %v359_v8  ;;  %s1043_s16 = sld [smem:[#allocation9 + $0x1]]  ;;  %s453_s19 = sld [smem:[#allocation10]] }
  0x8f   : > { %1318 = vmatpush3.bf16.msra.mxu0 %v1317_v4  ;;  %v1341_v12 = vpack.c.bf16 %v461_v11, %v460_v10  ;;  %v463_v14 = vld [vmem:[#allocation2 + $0x98] sm:$0xff]  ;;  %v361_v16 = vld [vmem:[#allocation2 + $0x30] sm:$0xff]  ;;  %v464_v19 = vld [vmem:[#allocation2 + $0xa0] sm:$0xff]  ;;  %s1965_s13 = scalar_select %p346_p7, %s1807_s28, 1 }
  0x90   : > { %1319 = vmatprep.subr.bf16.mxu0 %v1742_v3  ;;  %v362_v17 = vld [vmem:[#allocation2 + $0x38] sm:$0xff]  ;;  %v1344_v18 = vpack.c.bf16 %v463_v14, %v462_v13  ;;  %v465_v20 = vld [vmem:[#allocation2 + $0xa8] sm:$0xff]  ;;  %v363_v22 = vld [vmem:[#allocation2 + $0x40] sm:$0xff]  ;;  %s1045_s15 = sld [smem:[#allocation10 + $0x1]]  ;;  %s1046_s17 = sld [smem:[#allocation9 + $0x2]] }
  0x91   : > { %1342 = vmatpush3.bf16.msra.mxu1 %v1341_v12  ;;  %v1326_v21 = vpack.c.bf16 %v362_v17, %v361_v16  ;;  %v364_v23 = vld [vmem:[#allocation2 + $0x48] sm:$0xff]  ;;  %v1347_v24 = vpack.c.bf16 %v465_v20, %v464_v19  ;;  %v466_v25 = vld [vmem:[#allocation2 + $0xb0] sm:$0xff]  ;;  %v467_v26 = vld [vmem:[#allocation2 + $0xb8] sm:$0xff]  ;;  %s1040_s18 = sshll.u32 %s1965_s13, 3  ;;  %s1048_s1 = sld [smem:[#allocation10 + $0x2]] }
  0x92   : > { %1343 = vmatprep.subr.bf16.mxu1 %v1742_v3  ;;  %v1329_v27 = vpack.c.bf16 %v364_v23, %v363_v22  ;;  %v365_v28 = vld [vmem:[#allocation2 + $0x50] sm:$0xff]  ;;  %v366_v29 = vld [vmem:[#allocation2 + $0x58] sm:$0xff]  ;;  %v1350_v30 = vpack.c.bf16 %v467_v26, %v466_v25  ;;  %v367_v32 = vld [vmem:[#allocation2 + $0x60] sm:$0xff]  ;;  %s349_s8 = scalar_lea.vmem %s2060_s5, %s1040_s18  ;;  %s1049_s26 = sld [smem:[#allocation9 + $0x3]] }
  0x93   : > { %1321 = vmatpush3.bf16.msra.mxu0 %v1320_v7  ;;  %v1332_v31 = vpack.c.bf16 %v366_v29, %v365_v28  ;;  %v368_v33 = vld [vmem:[#allocation2 + $0x68] sm:$0xff]  ;;  %v369_v35 = vld [vmem:[#allocation2 + $0x70] sm:$0xff]  ;;  %v370_v36 = vld [vmem:[#allocation2 + $0x78] sm:$0xff]  ;;  %v372_v63 = vstv %s371_s14  ;;  %s1051_s30 = sld [smem:[#allocation10 + $0x3]]  ;;  %s337_s12 = sand.u32 1, %s1725_s25  }
  0x94   : > { %1322 = vmatprep.subr.bf16.mxu0 %v1742_v3  ;;  %v1335_v34 = vpack.c.bf16 %v368_v33, %v367_v32  ;;  %v1338_v37 = vpack.c.bf16 %v370_v36, %v369_v35  ;;  %v354_v38 = vld [vmem:[%s349_s8] sm:$0xff]  ;;  %v469_v40 = vld [vmem:[#allocation2 + $0xc8] sm:$0xff]  ;;  %v470_v42 = vld [vmem:[#allocation2 + $0xd0] sm:$0xff]  ;;  %v477_v33 = vstv %s1043_s16  ;;  %s1039_s22 = sshll.u32 %s337_s12, 3  ;;  %s1053_s20 = sshll.u32 %s1807_s28, 7 }
  0x95   : > { %1345 = vmatpush3.bf16.msra.mxu1 %v1344_v18  ;;  %v468_v39 = vld [vmem:[#allocation2 + $0xc0] sm:$0xff]  ;;  %v471_v43 = vld [vmem:[#allocation2 + $0xd8] sm:$0xff]  ;;  %v473_v46 = vld [vmem:[#allocation2 + $0xe8] sm:$0xff]  ;;  %s339_s23 = scalar_lea.vmem [#allocation12], %s1039_s22  ;;  %s2014_s29 = scalar_lea.hbm %s2061_s6, %s1053_s20 }
  0x96   : > { %1346 = vmatprep.subr.bf16.mxu1 %v1742_v3  ;;  %v1353_v41 = vpack.c.bf16 %v469_v40, %v468_v39  ;;  %v1356_v44 = vpack.c.bf16 %v471_v43, %v470_v42  ;;  %v472_v45 = vld [vmem:[#allocation2 + $0xe0] sm:$0xff]  ;;  %v474_v48 = vld [vmem:[#allocation2 + $0xf0] sm:$0xff]  ;;  %v475_v49 = vld [vmem:[#allocation2 + $0xf8] sm:$0xff]  ;;  %v454_v39 = vstv %s453_s19  ;;  %s886_s21 = sshll.u32 %s339_s23, 4  ;;  %s869_s8 = scalar_lea.sflag [#allocation4], %s337_s12  ;;  %s887_s21 = int_to_ptr.vmem [resolvable:$true] %s886_s21 }
  0x97   : > { %1324 = vmatpush3.bf16.msra.mxu0 %v1323_v15  ;;  %v1359_v47 = vpack.c.bf16 %v473_v46, %v472_v45  ;;  %v1362_v50 = vpack.c.bf16 %v475_v49, %v474_v48  ;;  %v566_v51 = vld [vmem:[#allocation2 + $0x100] sm:$0xff]  ;;  %v567_v52 = vld [vmem:[#allocation2 + $0x108] sm:$0xff]  ;;  %v568_v53 = vld [vmem:[#allocation2 + $0x110] sm:$0xff]  ;;  %v559_v45 = vstv %s1045_s15  ;;  %s1655_s14 = scalar_lea.vmem %s887_s21, 128  ;;  %p2090_p11 = scmp.ne.s32.totalorder %s2074_s11, 0 }
  0x98   : > { %1325 = vmatprep.subr.bf16.mxu0 %v1742_v3  ;;  %v1365_v54 = vpack.c.bf16 %v567_v52, %v566_v51  ;;  %v569_v55 = vld [vmem:[#allocation2 + $0x118] sm:$0xff]  ;;  %v570_v57 = vld [vmem:[#allocation2 + $0x120] sm:$0xff]  ;;  %v571_v58 = vld [vmem:[#allocation2 + $0x128] sm:$0xff]  ;;  %p1656_p8 = scmp.ne.s32.totalorder %s887_s21, %s1655_s14  ;;  %s1745_s16 = smov [#allocation12]  }
  0x99   : > { %1348 = vmatpush3.bf16.msra.mxu1 %v1347_v24  ;;  %v1368_v56 = vpack.c.bf16 %v569_v55, %v568_v53  ;;  %v1371_v59 = vpack.c.bf16 %v571_v58, %v570_v57  ;;  %v572_v60 = vld [vmem:[#allocation2 + $0x130] sm:$0xff]  ;;  %v573_v61 = vld [vmem:[#allocation2 + $0x138] sm:$0xff]  ;;  %v1042_v4 = vld [vmem:[#allocation6] ss:$0 sm:$0xff]  ;;  %s1659_s19 = sshll.u32 %s1745_s16, 4  ;;  %s1660_s19 = int_to_ptr.vmem [resolvable:$false] %s1659_s19 }
  0x9a   : > { %1349 = vmatprep.subr.bf16.mxu1 %v1742_v3  ;;  %v1374_v62 = vpack.c.bf16 %v573_v61, %v572_v60  ;;  %v574_v9 = vld [vmem:[#allocation2 + $0x140] sm:$0xff]  ;;  %v575_v10 = vld [vmem:[#allocation2 + $0x148] sm:$0xff]  ;;  %v576_v12 = vld [vmem:[#allocation2 + $0x150] sm:$0xff]  ;;  %p1657_p13 = pnand %p1656_p8, %p2090_p11  ;;  %s1661_s15 = scalar_lea.vmem %s1660_s19, 256 }
  0x9b   : > { %1327 = vmatpush3.bf16.msra.mxu0 %v1326_v21  ;;  %v1377_v11 = vpack.c.bf16 %v575_v10, %v574_v9  ;;  %v577_v13 = vld [vmem:[#allocation2 + $0x158] sm:$0xff]  ;;  %v578_v15 = vld [vmem:[#allocation2 + $0x160] sm:$0xff]  ;;  %v579_v16 = vld [vmem:[#allocation2 + $0x168] sm:$0xff]  ;;  %p1662_p6 = scmp.lt.s32.totalorder %s887_s21, %s1660_s19  ;;  %p1663_p5 = scmp.lt.s32.totalorder %s1661_s15, %s1655_s14 }
  0x9c   : > { %1328 = vmatprep.subr.bf16.mxu0 %v1742_v3  ;;  %v1380_v14 = vpack.c.bf16 %v577_v13, %v576_v12  ;;  %v1383_v17 = vpack.c.bf16 %v579_v16, %v578_v15  ;;  %v580_v18 = vld [vmem:[#allocation2 + $0x170] sm:$0xff]  ;;  %v581_v19 = vld [vmem:[#allocation2 + $0x178] sm:$0xff]  ;;  %v672_v21 = vld [vmem:[#allocation2 + $0x180] sm:$0xff]  ;;  %v665_v16 = vstv %s1048_s1  ;;  %p1658_p1 = pneg %p1657_p13 }
  0x9d   : > { %1351 = vmatpush3.bf16.msra.mxu1 %v1350_v30  ;;  %v1386_v20 = vpack.c.bf16 %v581_v19, %v580_v18  ;;  %v673_v22 = vld [vmem:[#allocation2 + $0x188] sm:$0xff]  ;;  %v674_v23 = vld [vmem:[#allocation2 + $0x190] sm:$0xff]  ;;  %v675_v25 = vld [vmem:[#allocation2 + $0x198] sm:$0xff]  ;;  %p1664_p9 = por %p1663_p5, %p1662_p6 }
  0x9e   : > { %1352 = vmatprep.subr.bf16.mxu1 %v1742_v3  ;;  %v1389_v24 = vpack.c.bf16 %v673_v22, %v672_v21  ;;  %v1392_v26 = vpack.c.bf16 %v675_v25, %v674_v23  ;;  %v677_v28 = vld [vmem:[#allocation2 + $0x1a8] sm:$0xff]  ;;  %v678_v30 = vld [vmem:[#allocation2 + $0x1b0] sm:$0xff]  ;;  %v1044_v40 = vld [vmem:[#allocation6 + $0x1] ss:$0 sm:$0xff] }
  0x9f   : > { %1330 = vmatpush3.bf16.msra.mxu0 %v1329_v27  ;;  %v676_v27 = vld [vmem:[#allocation2 + $0x1a0] sm:$0xff]  ;;  %v681_v57 = vld [vmem:[#allocation2 + $0x1c8] sm:$0xff]  ;;  %v683_v60 = vld [vmem:[#allocation2 + $0x1d8] sm:$0xff]  ;;  %p1665_p0 = pnand %p1664_p9, %p1658_p1 }
  0xa0   : > { %1331 = vmatprep.subr.bf16.mxu0 %v1742_v3  ;;  %v1395_v29 = vpack.c.bf16 %v677_v28, %v676_v27  ;;  %v1047_v12 = vld [vmem:[#allocation6 + $0x2] ss:$0 sm:$0xff]  ;;  %v782_v27 = vld [vmem:[#allocation8 + $0x20] sm:$0xff]  ;;  %v783_v28 = vld [vmem:[#allocation8 + $0x28] sm:$0xff] }
  0xa1   : > { %1354 = vmatpush3.bf16.msra.mxu1 %v1353_v41  ;;  %v781_v25 = vld [vmem:[#allocation8 + $0x18] sm:$0xff] }
  0xa2   : > { %1355 = vmatprep.subr.bf16.mxu1 %v1742_v3 }
  0xa3   : > { %1333 = vmatpush3.bf16.msra.mxu0 %v1332_v31  ;;  %v679_v31 = vld [vmem:[#allocation2 + $0x1b8] sm:$0xff] }
  0xa4   : > { %1334 = vmatprep.subr.bf16.mxu0 %v1742_v3  ;;  %v1398_v32 = vpack.c.bf16 %v679_v31, %v678_v30  ;;  %v784_v30 = vld [vmem:[#allocation8 + $0x30] sm:$0xff]  ;;  %v785_v31 = vld [vmem:[#allocation8 + $0x38] sm:$0xff] }
  0xa5   : > { %1357 = vmatpush3.bf16.msra.mxu1 %v1356_v44 }
  0xa6   : > { %1358 = vmatprep.subr.bf16.mxu1 %v1742_v3 }
  0xa7   : > { %1336 = vmatpush3.bf16.msra.mxu0 %v1335_v34 }
  0xa8   : > { %1337 = vmatprep.subr.bf16.mxu0 %v1742_v3 }
  0xa9   : > { %1360 = vmatpush3.bf16.msra.mxu1 %v1359_v47 }
  0xaa   : > { %1361 = vmatprep.subr.bf16.mxu1 %v1742_v3 }
  0xab   : > { %1339 = vmatpush3.bf16.msra.mxu0 %v1338_v37 }
  0xac   : > { %1364 = vmatprep.subr.bf16.mxu0 %v1742_v3 }
  0xad   : > { %1363 = vmatpush3.bf16.msra.mxu1 %v1362_v50 }
  0xae   : > { %1174 = vmatmul.mubr.f32.vlgmr.msra.gmra.mrb[0].mxu0 %v354_v38  ;;  %1388 = vmatprep.subr.bf16.mxu1 %v1742_v3 }
  0xaf   : > { %1243 = vmatprep.mubr.msk.f32.mxu0 %vm1743_vm0, %v1744_v6  ;;  %1366 = vmatpush3.bf16.msra.mxu0 %v1365_v54 }
  0xb0   : > { %1367 = vmatprep.subr.bf16.mxu0 %v1742_v3 }
  0xb3   : > { %1369 = vmatpush3.bf16.msra.mxu0 %v1368_v56  ;;  %v680_v56 = vld [vmem:[#allocation2 + $0x1c0] sm:$0xff] }
  0xb4   : > { %1370 = vmatprep.subr.bf16.mxu0 %v1742_v3  ;;  %v1401_v58 = vpack.c.bf16 %v681_v57, %v680_v56 }
  0xb7   : > { %1372 = vmatpush3.bf16.msra.mxu0 %v1371_v59  ;;  %v682_v59 = vld [vmem:[#allocation2 + $0x1d0] sm:$0xff] }
  0xb8   : > { %1373 = vmatprep.subr.bf16.mxu0 %v1742_v3  ;;  %v1404_v61 = vpack.c.bf16 %v683_v60, %v682_v59 }
  0xbb   : > { %1375 = vmatpush3.bf16.msra.mxu0 %v1374_v62  ;;  %v684_v62 = vld [vmem:[#allocation2 + $0x1e0] sm:$0xff] }
  0xbc   : > { %1376 = vmatprep.subr.bf16.mxu0 %v1742_v3 }
  0xbf   : > { %1378 = vmatpush3.bf16.msra.mxu0 %v1377_v11 }
  0xc0   : > { %1379 = vmatprep.subr.bf16.mxu0 %v1742_v3 }
  0xc3   : > { %1381 = vmatpush3.bf16.msra.mxu0 %v1380_v14 }
  0xc4   : > { %1382 = vmatprep.subr.bf16.mxu0 %v1742_v3 }
  0xc7   : > { %1384 = vmatpush3.bf16.msra.mxu0 %v1383_v17 }
  0xc8   : > { %1385 = vmatprep.subr.bf16.mxu0 %v1742_v3 }
  0xcb   : > { %1387 = vmatpush3.bf16.msra.mxu0 %v1386_v20 }
  0xcc   : > { %1412 = vmatprep.subr.bf16.mxu0 %v1742_v3 }
 0x181   : > { %v439_v0 = vpop.f32.mrb[0].mxu0 }
 0x182   : > { %v440_v1 = vadd.f32 %v439_v0, %v372_v63  ;;  %v1175_v2 = vpop.f32.mrb[1].mxu0  ;;  %v686_v0 = vld [vmem:[#allocation2 + $0x1f0] sm:$0xff] }
 0x184   : > { %1531 = vtanh.f32 %v440_v1  ;;  %v687_v1 = vld [vmem:[#allocation2 + $0x1f8] sm:$0xff] }
 0x185   : > { %v1410_v2 = vpack.c.bf16 %v687_v1, %v686_v0 }
 0x18e   : > { %v1532_v5 = vpop.eup %1531 }
 0x18f   : > { %v449_v7 = vmul.f32 %v1532_v5, %v1042_v4  ;;  %v451_v37 = vmul.f32 %v1532_v5, %v1532_v5  ;;  %v778_v4 = vld [vmem:[#allocation8] sm:$0xff]  ;;  %v779_v5 = vld [vmem:[#allocation8 + $0x8] sm:$0xff] }
 0x191   : > { %v450_v8 = vadd.f32 %v449_v7, %v354_v38  ;;  %v452_v38 = vsub.f32 1.0, %v451_v37  ;;  %v1413_v7 = vpack.c.bf16 %v779_v5, %v778_v4  ;;  %v789_v37 = vld [vmem:[#allocation8 + $0x58] sm:$0xff] }
 0x193   : > { %1209 = vmatmul.mubr.f32.vlgmr.msra.gmra.mrb[0].mxu1 %v450_v8  ;;  %v455_v41 = vmul.f32 %v454_v39, %v452_v38  ;;  %v790_v39 = vld [vmem:[#allocation8 + $0x60] sm:$0xff] }
 0x194   : > { %1278 = vmatprep.mubr.msk.f32.mxu1 %vm1743_vm0, %v1744_v6  ;;  %1390 = vmatpush3.bf16.msra.mxu1 %v1389_v24  ;;  %v780_v24 = vld [vmem:[#allocation8 + $0x10] sm:$0xff] }
 0x195   : > { %1391 = vmatprep.subr.bf16.mxu1 %v1742_v3  ;;  %v456_v48 = vadd.f32 1.0, %v455_v41 }
 0x197   : > { %v457_v50 = vand.u32 2147483647, %v456_v48 }
 0x198   : > { %1393 = vmatpush3.bf16.msra.mxu1 %v1392_v26  ;;  %v1416_v26 = vpack.c.bf16 %v781_v25, %v780_v24 }
 0x199   : > { %1394 = vmatprep.subr.bf16.mxu1 %v1742_v3  ;;  %v458_v53 = vadd.f32 1e-15, %v457_v50 }
 0x19c   : > { %1396 = vmatpush3.bf16.msra.mxu1 %v1395_v29  ;;  %v1419_v29 = vpack.c.bf16 %v783_v28, %v782_v27 }
 0x19d   : > { %1397 = vmatprep.subr.bf16.mxu1 %v1742_v3 }
 0x1a0   : > { %1399 = vmatpush3.bf16.msra.mxu1 %v1398_v32  ;;  %v1422_v32 = vpack.c.bf16 %v785_v31, %v784_v30 }
 0x1a1   : > { %1400 = vmatprep.subr.bf16.mxu1 %v1742_v3 }
 0x1a4   : > { %1402 = vmatpush3.bf16.msra.mxu1 %v1401_v58 }
 0x1a5   : > { %1403 = vmatprep.subr.bf16.mxu1 %v1742_v3 }
 0x1a8   : > { %1405 = vmatpush3.bf16.msra.mxu1 %v1404_v61 }
 0x1a9   : > { %1406 = vmatprep.subr.bf16.mxu1 %v1742_v3 }
 0x266   : > { %v544_v34 = vpop.f32.mrb[0].mxu1 }
 0x267   : > { %v545_v35 = vadd.f32 %v544_v34, %v477_v33  ;;  %v1210_v36 = vpop.f32.mrb[1].mxu1  ;;  %v786_v33 = vld [vmem:[#allocation8 + $0x40] sm:$0xff]  ;;  %v787_v34 = vld [vmem:[#allocation8 + $0x48] sm:$0xff] }
 0x268   : > { %v788_v36 = vld [vmem:[#allocation8 + $0x50] sm:$0xff] }
 0x269   : > { %1533 = vtanh.f32 %v545_v35  ;;  %v1425_v35 = vpack.c.bf16 %v787_v34, %v786_v33  ;;  %v1428_v38 = vpack.c.bf16 %v789_v37, %v788_v36 }
 0x273   : > { %v1534_v42 = vpop.eup %1533 }
 0x274   : > { %v556_v43 = vmul.f32 %v1534_v42, %v1534_v42  ;;  %v554_v44 = vmul.f32 %v1534_v42, %v1044_v40  ;;  %v791_v40 = vld [vmem:[#allocation8 + $0x68] sm:$0xff]  ;;  %v792_v42 = vld [vmem:[#allocation8 + $0x70] sm:$0xff] }
 0x275   : > { %v1431_v41 = vpack.c.bf16 %v791_v40, %v790_v39 }
 0x276   : > { %v557_v46 = vsub.f32 1.0, %v556_v43  ;;  %v555_v47 = vadd.f32 %v554_v44, %v450_v8  ;;  %v583_v8 = vstv %s1046_s17  ;;  %v793_v43 = vld [vmem:[#allocation8 + $0x78] sm:$0xff] }
 0x277   : > { %v1434_v44 = vpack.c.bf16 %v793_v43, %v792_v42 }
 0x278   : > { %v560_v49 = vmul.f32 %v559_v45, %v557_v46  ;;  %1244 = vmatmul.mubr.f32.vlgmr.msra.gmra.mrb[2].mxu0 %v555_v47  ;;  %v689_v45 = vstv %s1049_s26 }
 0x279   : > { %1313 = vmatprep.mubr.msk.f32.mxu0 %vm1743_vm0, %v1744_v6  ;;  %v685_v6 = vld [vmem:[#allocation2 + $0x1e8] sm:$0xff]  ;;  %1414 = vmatpush3.bf16.msra.mxu0 %v1413_v7 }
 0x27a   : > { %v561_v51 = vadd.f32 1.0, %v560_v49  ;;  %v1407_v63 = vpack.c.bf16 %v685_v6, %v684_v62  ;;  %1415 = vmatprep.subr.bf16.mxu0 %v1742_v3  ;;  %v1050_v49 = vld [vmem:[#allocation6 + $0x3] ss:$0 sm:$0xff] }
 0x27c   : > { %v562_v52 = vand.u32 2147483647, %v561_v51  ;;  %1408 = vmatpush3.bf16.msra.mxu1 %v1407_v63 }
 0x27d   : > { %1409 = vmatprep.subr.bf16.mxu1 %v1742_v3  ;;  %1417 = vmatpush3.bf16.msra.mxu0 %v1416_v26 }
 0x27e   : > { %v563_v54 = vadd.f32 1e-15, %v562_v52  ;;  %1418 = vmatprep.subr.bf16.mxu0 %v1742_v3 }
 0x280   : > { %v564_v55 = vmul.f32 %v563_v54, %v458_v53  ;;  %1411 = vmatpush3.bf16.msra.mxu1 %v1410_v2  ;;  %v771_v53 = vstv %s1051_s30 }
 0x281   : > { %1420 = vmatpush3.bf16.msra.mxu0 %v1419_v29 }
 0x282   : > { %1421 = vmatprep.subr.bf16.mxu0 %v1742_v3 }
 0x285   : > { %1423 = vmatpush3.bf16.msra.mxu0 %v1422_v32 }
 0x286   : > { %1424 = vmatprep.subr.bf16.mxu0 %v1742_v3 }
 0x289   : > { %1426 = vmatpush3.bf16.msra.mxu0 %v1425_v35 }
 0x28a   : > { %1427 = vmatprep.subr.bf16.mxu0 %v1742_v3 }
 0x28d   : > { %1429 = vmatpush3.bf16.msra.mxu0 %v1428_v38 }
 0x28e   : > { %1430 = vmatprep.subr.bf16.mxu0 %v1742_v3 }
 0x291   : > { %1432 = vmatpush3.bf16.msra.mxu0 %v1431_v41 }
 0x292   : > { %1433 = vmatprep.subr.bf16.mxu0 %v1742_v3 }
 0x295   : > { %1435 = vmatpush3.bf16.msra.mxu0 %v1434_v44 }
 0x34b   : > { %v650_v9 = vpop.f32.mrb[2].mxu0 }
 0x34c   : > { %v651_v10 = vadd.f32 %v650_v9, %v583_v8  ;;  %v1245_v11 = vpop.f32.mrb[3].mxu0 }
 0x34e   : > { %1535 = vtanh.f32 %v651_v10 }
 0x358   : > { %v1536_v13 = vpop.eup %1535 }
 0x359   : > { %v662_v14 = vmul.f32 %v1536_v13, %v1536_v13  ;;  %v660_v15 = vmul.f32 %v1536_v13, %v1047_v12 }
 0x35b   : > { %v663_v17 = vsub.f32 1.0, %v662_v14  ;;  %v661_v18 = vadd.f32 %v660_v15, %v555_v47 }
 0x35d   : > { %1279 = vmatmul.mubr.f32.vlgmr.msra.gmra.mrb[2].mxu1 %v661_v18  ;;  %v666_v19 = vmul.f32 %v665_v16, %v663_v17 }
 0x35f   : > { %v667_v20 = vadd.f32 1.0, %v666_v19 }
 0x361   : > { %v668_v21 = vand.u32 2147483647, %v667_v20 }
 0x363   : > { %v669_v22 = vadd.f32 1e-15, %v668_v21 }
 0x365   : > { %v670_v23 = vmul.f32 %v669_v22, %v564_v55 }
 0x430   : > { %v756_v46 = vpop.f32.mrb[2].mxu1 }
 0x431   : > { %v757_v47 = vadd.f32 %v756_v46, %v689_v45  ;;  %v1280_v48 = vpop.f32.mrb[3].mxu1 }
 0x433   : > { %1537 = vtanh.f32 %v757_v47 }
 0x43d   : > { %v1538_v50 = vpop.eup %1537 }
 0x43e   : > { %v768_v51 = vmul.f32 %v1538_v50, %v1538_v50  ;;  %v766_v52 = vmul.f32 %v1538_v50, %v1050_v49 }
 0x440   : > { %v769_v54 = vsub.f32 1.0, %v768_v51  ;;  %v767_v55 = vadd.f32 %v766_v52, %v661_v18 }
 0x442   : > { %v772_v3 = vmul.f32 %v771_v53, %v769_v54  ;;  %777 = vst [vmem:[%s339_s23] sm:$0xff] %v767_v55 }
 0x444   : > { %v773_v56 = vadd.f32 1.0, %v772_v3 }
 0x446   : > { %v774_v57 = vand.u32 2147483647, %v773_v56 }
 0x448   : > { %v775_v58 = vadd.f32 1e-15, %v774_v57 }
 0x44a   : > { %v776_v59 = vmul.f32 %v775_v58, %v670_v23 }
 0x44c   : > { %1314 = vmatmul.mubr.f32.vlgmr.msra.gmra.mrb[4].mxu0 %v776_v59 }
 0x44d   : > { %1668 = shalt.err (!%p1665_p0)
}
 0x44e   : > { %s1669_s28 = scalar_lea.hbm %s2014_s29, 128  ;;  %s1673_s26 = scalar_lea.hbm %s2061_s6, 256 }
 0x44f   : > { %p1670_p10 = scmp.ne.s32.totalorder %s2014_s29, %s1669_s28  ;;  %p1674_p3 = scmp.lt.u32.totalorder %s2014_s29, %s2061_s6 }
 0x450   : > { %p1675_p4 = scmp.lt.u32.totalorder %s1673_s26, %s1669_s28  ;;  %p1677_p8 = scmp.lt.u32.totalorder %s1669_s28, %s2014_s29 }
 0x451   : > { %p1671_p2 = pnand %p1670_p10, %p2090_p11 }
 0x452   : > { %p1676_p7 = por %p1675_p4, %p1674_p3 }
 0x453   : > { %p1672_p12 = pneg %p1671_p2 }
 0x454   : > { %p1678_p13 = por %p1677_p8, %p1676_p7 }
 0x456   : > { %p1679_p1 = pnand %p1678_p13, %p1672_p12 }
 0x458   : > { %1682 = shalt.err (!%p1679_p1)
}
 0x459   : > { %1456 = dma.vmem_to_hbm [thread:$0]  (%p2090_p11), %s887_s21, 128, %s2014_s29, %s869_s8   ;;  %vm866_vm1 = vcmask 31744  }
 0x45a   : > { %s353_s20 = scalar_lea.vmem %s2062_s7, %s1040_s18 }
 0x51f   : > { %v860_v60 = vpop.f32.mrb[4].mxu0 }
 0x520   : > { %1539 = vlog2.f32 %v860_v60  ;;  %v1315_v61 = vpop.f32.mrb[5].mxu0 }
 0x52a   : > { %v1540_v62 = vpop.eup %1539 }
 0x52b   : > { %v865_v6 = vmul.f32 0.6931472, %v1540_v62 }
 0x52d   : > { %867 = vst.msk [vmem:[%s353_s20] sm:$0xff] %vm866_vm1, %v865_v6 }
 0x52e PF: > { %s2091_s10 = sld [smem:[#allocation21_spill]]  ;;  %p1488_p6 = scmp.ge.s32.totalorder %s1733_s27, 2 }
 0x52f   : > { %s901_s11 = sand.u32 1, %s1721_s24  }
 0x530   : > { %s902_s21 = scalar_lea.sflag [#allocation4], %s901_s11 }
 0x534   : > { %p2092_p5 = scmp.ne.s32.totalorder %s2091_s10, 0 }
 0x536   : > { %p1475_p11 = pnand %p1488_p6, %p2092_p5 }
 0x538   : > { %1716 = dma.done.wait (!%p1475_p11), %s902_s21, 128  }
 0x539   : > { %1718 = vsyncadd (!%p1475_p11), %s902_s21, 4294967168  ;;  %s2093_s27 = sld [smem:[#allocation19_spill]]  ;;  %s2094_s13 = sld [smem:[#allocation18_spill]] }
 0x53a   : > { %s2095_s26 = sld [smem:[#allocation20_spill]]  ;;  %s2096_s24 = smov %s1725_s25 }
 0x53f   : > { %p22_p9 = scmp.ge.s32.totalorder %s2093_s27, 4   ;;  %s2097_s25 = smov %s2094_s13 }
 0x541   :  { %24 = sbr.rel (!%p22_p9) target bundleno = 9 (0x9), region = 116 }
 0x548   :  { %914 = vsyncpa [#allocation3], 1 }
 0x549   :  { %916 = vsyncpa [#allocation3 + $0x1], 1 }
 0x54a   :  { %917 = vsyncpa [#allocation7], 1 }
 0x54b   :  { %918 = vsyncpa [#allocation4], 1 }
 0x54c   :  { %920 = vsyncpa [#allocation4 + $0x1], 1 }
 0x54d   :  { %921 = vsyncpa [#allocation5], 1 }
 0x54e   :  { %923 = vsyncpa [#allocation5 + $0x1], 1 }
 0x54f   :  { %924 = vsyncpa [#allocation11], 1 }

</bundles_post_ra>
